<compile_context>
chip_gen: v7x
topology: tpu7x:2x2x1
jax: 0.10.0
libtpu: 0.0.40
codegen_flags: <defaults>
</compile_context>

<pallas_src>
import jax
import jax.numpy as jnp
from jax.experimental import pallas as pl
from jax.experimental.pallas import tpu as pltpu


_SMALL_FALLBACK_BYTES = 64 << 10   # below this (in+out), XLA concat beats launch cost
_VMEM_LIMIT_BYTES = 32 << 20       # explicit scoped-VMEM limit, safe on v5e/v6e/v7x


def _make_cat_kernel(sel_idx: int, D: int):
    """Kernel over flattened rows: out_row = [v1_row[sel*D : sel*D+D] | v1_row]."""
    lo = sel_idx * D

    def kernel(x_ref, o_ref):
        # x_ref: (TB, 3*D)   o_ref: (TB, 4*D)
        x = x_ref[...]
        # Assemble the full output row in registers and do ONE unmasked
        # full-width store (instead of two lane-offset masked stores).
        o_ref[...] = jnp.concatenate([x[:, lo:lo + D], x], axis=-1)

    return kernel


def _vmem_step_budget_bytes() -> int:
    """Per-step (in+out) block byte budget, derived per chip generation."""
    try:
        cap = pltpu.get_tpu_info().vmem_capacity_bytes   # 128 MiB v5e/v6e, 64 MiB v7x
    except Exception:
        cap = 64 << 20                                   # conservative (v7x) default
    # Double-buffered footprint is ~2x this budget; keep well under both the
    # physical capacity and the explicit 32 MiB scoped limit we request.
    return min(cap // 8, 12 << 20)


def _pick_tb(B: int, D: int, itemsize: int) -> int:
    """Batch-tile size: big blocks for HBM roofline, bounded by VMEM and megacore."""
    if B <= 8:
        return B                       # block sublane dim == full array dim: legal
    bytes_per_row = (3 + 4) * D * itemsize
    tb = _vmem_step_budget_bytes() // max(bytes_per_row, 1)
    tb = max(8, min(B, tb))
    # Keep >= 4 grid steps for large B so ("parallel",) can shard the batch
    # axis across v7x's two TensorCores (and keeps the pipeline fed).
    if B >= 64:
        tb = min(tb, max(8, pl.cdiv(B, 4)))
    return max(8, (tb // 8) * 8)       # multiple of 8 sublanes


def model_forward(v1: jax.Array) -> jax.Array:
    B, S, D = v1.shape
    assert S == 3, "torch.split(v1, [1,1,1], dim=1) requires dim-1 size 3"

    # Static shape-based branch (shapes are concrete, as in PyTorch):
    # split[0]/split[1]/split[2] all share the last dim D, so the elif on
    # split[2] is unreachable.
    sel = 0 if D > 2 else 1

    itemsize = jnp.dtype(v1.dtype).itemsize
    total_bytes = B * (S + (S + 1)) * D * itemsize   # in + out traffic

    # Fallbacks: tiny inputs (launch overhead dominates) and the lane-sparse
    # D<=2 layout (would waste ~16x of lane/DMA width) go straight through XLA.
    if D <= 2 or total_bytes < _SMALL_FALLBACK_BYTES:
        return jnp.concatenate([v1[:, sel:sel + 1, :], v1], axis=1)

    # Lane-dense 2D layout: batch on sublanes, (split, D) flattened onto lanes.
    flat_in = S * D
    flat_out = (S + 1) * D
    x2 = v1.reshape(B, flat_in)

    TB = _pick_tb(B, D, itemsize)
    grid = (pl.cdiv(B, TB),)

    out2 = pl.pallas_call(
        _make_cat_kernel(sel, D),
        out_shape=jax.ShapeDtypeStruct((B, flat_out), v1.dtype),
        grid=grid,
        in_specs=[pl.BlockSpec((TB, flat_in), lambda i: (i, 0))],
        out_specs=pl.BlockSpec((TB, flat_out), lambda i: (i, 0)),
        compiler_params=pltpu.CompilerParams(
            dimension_semantics=("parallel",),
            vmem_limit_bytes=_VMEM_LIMIT_BYTES),
        cost_estimate=pl.CostEstimate(
            flops=0, transcendentals=0, bytes_accessed=total_bytes),
    )(x2)

    return out2.reshape(B, S + 1, D)


def _reference(v1: jax.Array) -> jax.Array:
    D = v1.shape[-1]
    sel = 0 if D > 2 else 1
    return jnp.concatenate([v1[:, sel:sel + 1, :], v1], axis=1)


if __name__ == "__main__":
    key = jax.random.PRNGKey(0)
    k1, k2, k3 = jax.random.split(key, 3)

    # Primary test: shapes consistent with the module (Linear(32, 7) implies D=32).
    # Tiny shape -> small-input fallback path.
    B, S, D = 2, 3, 32
    v1 = jax.random.normal(k1, (B, S, D), dtype=jnp.float32)
    out = jax.block_until_ready(model_forward(v1))
    assert out.shape == (B, S + 1, D), out.shape
    assert jnp.allclose(out, _reference(v1)), "mismatch vs reference (small shape)"

    # Pallas-path test: larger batch so the kernel + batch tiling is exercised.
    Bb = 2048
    v1_big = jax.random.normal(k2, (Bb, 3, 32), dtype=jnp.float32)
    out_big = jax.block_until_ready(model_forward(v1_big))
    assert out_big.shape == (Bb, 4, 32), out_big.shape
    assert jnp.allclose(out_big, _reference(v1_big)), "mismatch vs reference (Pallas path)"

    # Secondary test: D <= 2 exercises the other (split[1]) branch (fallback path).
    v1_tiny_d = jax.random.normal(k3, (2, 3, 2), dtype=jnp.float32)
    out_tiny = jax.block_until_ready(model_forward(v1_tiny_d))
    assert jnp.allclose(out_tiny, _reference(v1_tiny_d)), "mismatch vs reference (D<=2)"

    print("KERNEL_OK")
</pallas_src>

<mosaic_0001>
module attributes {stable_mosaic.version = 11 : i64} {
  func.func @kernel(%arg0: i32, %arg1: memref<512x96xf32, #tpu.memory_space<vmem>>, %arg2: memref<512x128xf32, #tpu.memory_space<vmem>>) attributes {dimension_semantics = [#tpu.dimension_semantics<parallel>], iteration_bounds = array<i64: 4>, scalar_prefetch = 0 : i64, scratch_operands = 0 : i64, tpu.core_type = #tpu.core_type<tc>, window_params = [{transform_indices = @transform_0, window_bounds = array<i64: 512, 96>}, {transform_indices = @transform_1, window_bounds = array<i64: 512, 128>}]} {
    %c0 = arith.constant 0 : index
    %c0_0 = arith.constant 0 : index
    %0 = vector.load %arg1[%c0, %c0_0] : memref<512x96xf32, #tpu.memory_space<vmem>>, vector<512x96xf32>
    %1 = vector.extract_strided_slice %0 {offsets = [0, 0], sizes = [512, 32], strides = [1, 1]} : vector<512x96xf32> to vector<512x32xf32>
    %2 = tpu.concatenate %1, %0 in 1 : vector<512x32xf32>, vector<512x96xf32> -> vector<512x128xf32>
    %c0_1 = arith.constant 0 : index
    %c0_2 = arith.constant 0 : index
    %3 = vector.load %arg2[%c0_1, %c0_2] : memref<512x128xf32, #tpu.memory_space<vmem>>, vector<512x128xf32>
    tpu.vector_store %arg2[%c0_1, %c0_2], %2 {strides = array<i32>} : memref<512x128xf32, #tpu.memory_space<vmem>>, vector<512x128xf32>,
    return
  }
  func.func @transform_0(%arg0: i32) -> (i32, i32) {
    %c0_i32 = arith.constant 0 : i32
    %c0_i32_0 = arith.constant 0 : i32
    return %arg0, %c0_i32 : i32, i32
  }
  func.func @transform_1(%arg0: i32) -> (i32, i32) {
    %c0_i32 = arith.constant 0 : i32
    %c0_i32_0 = arith.constant 0 : i32
    return %arg0, %c0_i32 : i32, i32
  }
}

</mosaic_0001>

<bundles_post_ra>
// kernel: tpu_custom_call.1
= control target key start
LH: loop header
LB: loop body
LE: loop exit
PB: predicated region body
PF: predicated region fallthrough
CT: control target
= control target key end

     0   :  { %6 = vsyncpa [#allocation3], 0  ;;  %s1399_s0 = inlined_call_operand.vmem [shape: f32[2048,96], index: 0, kind: input, shape index: {}]   ;;  %s1400_s1 = inlined_call_operand.hbm [shape: f32[2048,128], index: 1, kind: output, shape index: {}]  }
   0x1   :  { %8 = vsyncpa [#allocation3 + $0x1], 0  ;;  %s776_s6 = smov 0   ;;  %s778_s7 = smov 0  }
   0x2   :  { %s780_s8 = smov 0   ;;  %s782_s9 = smov 0  }
   0x3 LB: > { %s797_s10 = sadd.s32 4294967295, %s760_s9   ;;  %s643_s11 = sadd.s32 4294967294, %s760_s9   ;;  %s760_s9 = sphi %s782_s9, %s1418_s9   ;;  %s756_s8 = sphi %s780_s8, %s1417_s8   ;;  %s752_s7 = sphi %s778_s7, %s1416_s7   ;;  %s748_s6 = sphi %s776_s6, %s1415_s6  }
   0x4   : > { %s801_s12 = sadd.s32 1, %s760_s9   ;;  %s47_s13 = sadd.s32 1, %s756_s8 }
   0x5   : > { %s44_s14 = ssub.s32 %s760_s9, %s801_s12  ;;  %p57_p0 = scmp.ne.s32.totalorder %s756_s8, %s752_s7 }
   0x6   : > { %p45_p1 = scmp.eq.s32.totalorder %s44_s14, 0  ;;  %p58_p2 = scmp.eq.s32.totalorder %s797_s10, 3 }
   0x7   : > { %p63_p3 = scmp.ne.s32.totalorder %s752_s7, %s748_s6  ;;  %p64_p4 = scmp.eq.s32.totalorder %s643_s11, 3 }
   0x8   : > { %s812_s15 = scalar_select %p45_p1, %s756_s8, %s47_s13  }
   0x9   : > { %p814_p5 = por %p58_p2, %p57_p0  ;;  %p818_p6 = por %p64_p4, %p63_p3 }
   0xa   : > { %p646_p7 = scmp.ge.s32.totalorder %s760_s9, 1  ;;  %p91_p8 = scmp.lt.s32.totalorder %s760_s9, 5 }
   0xc   : > { %p92_p9 = pnand %p646_p7, %p91_p8 }
   0xe   : > { %95 = sbr.rel (%p92_p9) target bundleno = 283 (0x11b), region = 24 }
  0x15   : > { %s648_s18 = sshll.u32 %s797_s10, 6  ;;  %s762_s23 = smov 32   ;;  %vm438_vm0 = vcmask 261120  }
  0x16   : > { %p112_p10 = scmp.lt.s32.totalorder %s648_s18, 255  ;;  %s108_s24 = sand.u32 1, %s752_s7  }
  0x17   : > { %s647_s25 = sshll.u32 %s108_s24, 9  ;;  %s655_s27 = sshll.u32 %s797_s10, 13 }
  0x18   : > { %s1420_s18 = smov (!%p112_p10, %s648_s18), 255  ;;  %s1133_s26 = scalar_lea.vmem [#allocation2], %s647_s25 }
  0x19   : > { %s649_s19 = sshll.u32 %s1420_s18, 3  ;;  %s581_s28 = sshll.u32 %s1133_s26, 4  ;;  %s1348_s28 = int_to_ptr.vmem [resolvable:$true] %s581_s28 }
  0x1a   : > { %s828_s22 = scalar_lea.vmem %s1399_s0, %s649_s19  ;;  %s1346_s2 = scalar_lea.hbm %s1400_s1, %s655_s27 }
  0x1b   : > { %v831_v0 = vld [vmem:[%s828_s22 + $0x10] sm:$0xff]  ;;  %v834_v1 = vld [vmem:[%s828_s22] sm:$0xff]  ;;  %v841_v2 = vld [vmem:[%s828_s22 + $0x18] sm:$0xff]  ;;  %s1358_s3 = scalar_lea.sflag [#allocation3], %s108_s24  ;;  %s698_s4 = scalar_lea.vmem %s1348_s28, 8192 }
  0x1c   : > { %250 = vrot.lane.b32.xlu1 %v831_v0, %s762_s23  ;;  %246 = vrot.lane.b32.xlu0 %v834_v1, %s762_s23  ;;  %v844_v3 = vld [vmem:[%s828_s22 + $0x8] sm:$0xff]  ;;  %v854_v5 = vld [vmem:[%s828_s22 + $0x20] sm:$0xff]  ;;  %p699_p11 = scmp.ne.s32.totalorder %s1348_s28, %s698_s4  ;;  %s763_s5 = smov [#allocation2]  }
  0x1d   : > { %v851_v4 = vld [vmem:[%s828_s22 + $0x28] sm:$0xff]  ;;  %v861_v6 = vld [vmem:[%s828_s22 + $0x38] sm:$0xff]  ;;  %v864_v7 = vld [vmem:[%s828_s22 + $0x30] sm:$0xff]  ;;  %s702_s10 = sshll.u32 %s763_s5, 4  ;;  %s703_s10 = int_to_ptr.vmem [resolvable:$false] %s702_s10 }
  0x1e   : > { %v871_v8 = vld [vmem:[%s828_s22 + $0x48] sm:$0xff]  ;;  %v874_v9 = vld [vmem:[%s828_s22 + $0x40] sm:$0xff]  ;;  %v881_v10 = vld [vmem:[%s828_s22 + $0x58] sm:$0xff]  ;;  %p700_p12 = pnand %p699_p11, %p814_p5  ;;  %s704_s11 = scalar_lea.vmem %s703_s10, 16384 }
  0x1f   : > { %v884_v11 = vld [vmem:[%s828_s22 + $0x50] sm:$0xff]  ;;  %v891_v12 = vld [vmem:[%s828_s22 + $0x68] sm:$0xff]  ;;  %v894_v13 = vld [vmem:[%s828_s22 + $0x60] sm:$0xff]  ;;  %p705_p0 = scmp.lt.s32.totalorder %s1348_s28, %s703_s10  ;;  %p706_p1 = scmp.lt.s32.totalorder %s704_s11, %s698_s4 }
  0x20   : > { %252 = vrot.lane.b32.xlu1 %v841_v2, %s762_s23  ;;  %248 = vrot.lane.b32.xlu0 %v844_v3, %s762_s23  ;;  %v901_v14 = vld [vmem:[%s828_s22 + $0x78] sm:$0xff]  ;;  %v904_v15 = vld [vmem:[%s828_s22 + $0x70] sm:$0xff]  ;;  %p701_p13 = pneg %p700_p12 }
  0x21   : > { %v911_v16 = vld [vmem:[%s828_s22 + $0x88] sm:$0xff]  ;;  %v914_v17 = vld [vmem:[%s828_s22 + $0x80] sm:$0xff]  ;;  %v921_v18 = vld [vmem:[%s828_s22 + $0x98] sm:$0xff]  ;;  %p707_p2 = por %p706_p1, %p705_p0 }
  0x22   : > { %v924_v19 = vld [vmem:[%s828_s22 + $0x90] sm:$0xff]  ;;  %v931_v20 = vld [vmem:[%s828_s22 + $0xa8] sm:$0xff]  ;;  %v934_v21 = vld [vmem:[%s828_s22 + $0xa0] sm:$0xff] }
  0x23   : > { %v941_v22 = vld [vmem:[%s828_s22 + $0xb8] sm:$0xff]  ;;  %v944_v23 = vld [vmem:[%s828_s22 + $0xb0] sm:$0xff]  ;;  %v951_v24 = vld [vmem:[%s828_s22 + $0xc8] sm:$0xff]  ;;  %p708_p3 = pnand %p707_p2, %p701_p13 }
  0x24   : > { %256 = vrot.lane.b32.xlu1 %v851_v4, %s762_s23  ;;  %254 = vrot.lane.b32.xlu0 %v854_v5, %s762_s23  ;;  %v954_v25 = vld [vmem:[%s828_s22 + $0xc0] sm:$0xff]  ;;  %v961_v26 = vld [vmem:[%s828_s22 + $0xd8] sm:$0xff] }
  0x25   : > { %v964_v27 = vld [vmem:[%s828_s22 + $0xd0] sm:$0xff]  ;;  %v971_v28 = vld [vmem:[%s828_s22 + $0xe8] sm:$0xff]  ;;  %v974_v29 = vld [vmem:[%s828_s22 + $0xe0] sm:$0xff] }
  0x26   : > { %v981_v30 = vld [vmem:[%s828_s22 + $0xf8] sm:$0xff]  ;;  %v984_v31 = vld [vmem:[%s828_s22 + $0xf0] sm:$0xff]  ;;  %v991_v32 = vld [vmem:[%s828_s22 + $0x108] sm:$0xff] }
  0x27   : > { %v994_v33 = vld [vmem:[%s828_s22 + $0x100] sm:$0xff]  ;;  %v1001_v34 = vld [vmem:[%s828_s22 + $0x118] sm:$0xff]  ;;  %v1004_v35 = vld [vmem:[%s828_s22 + $0x110] sm:$0xff] }
  0x28   : > { %260 = vrot.lane.b32.xlu1 %v861_v6, %s762_s23  ;;  %258 = vrot.lane.b32.xlu0 %v864_v7, %s762_s23  ;;  %v1011_v36 = vld [vmem:[%s828_s22 + $0x128] sm:$0xff]  ;;  %v1014_v37 = vld [vmem:[%s828_s22 + $0x120] sm:$0xff] }
  0x29   : > { %v1021_v38 = vld [vmem:[%s828_s22 + $0x138] sm:$0xff]  ;;  %v1024_v39 = vld [vmem:[%s828_s22 + $0x130] sm:$0xff]  ;;  %v1031_v40 = vld [vmem:[%s828_s22 + $0x148] sm:$0xff] }
  0x2a   : > { %v1034_v41 = vld [vmem:[%s828_s22 + $0x140] sm:$0xff]  ;;  %v1041_v42 = vld [vmem:[%s828_s22 + $0x158] sm:$0xff]  ;;  %v1044_v43 = vld [vmem:[%s828_s22 + $0x150] sm:$0xff] }
  0x2b   : > { %v1051_v44 = vld [vmem:[%s828_s22 + $0x168] sm:$0xff]  ;;  %v1054_v45 = vld [vmem:[%s828_s22 + $0x160] sm:$0xff]  ;;  %v1061_v46 = vld [vmem:[%s828_s22 + $0x178] sm:$0xff] }
  0x2c   : > { %264 = vrot.lane.b32.xlu1 %v871_v8, %s762_s23  ;;  %262 = vrot.lane.b32.xlu0 %v874_v9, %s762_s23  ;;  %v1064_v47 = vld [vmem:[%s828_s22 + $0x170] sm:$0xff]  ;;  %v1071_v48 = vld [vmem:[%s828_s22 + $0x188] sm:$0xff] }
  0x2d   : > { %v1074_v49 = vld [vmem:[%s828_s22 + $0x180] sm:$0xff]  ;;  %v1081_v50 = vld [vmem:[%s828_s22 + $0x198] sm:$0xff]  ;;  %v1084_v51 = vld [vmem:[%s828_s22 + $0x190] sm:$0xff] }
  0x2e   : > { %v1091_v52 = vld [vmem:[%s828_s22 + $0x1a8] sm:$0xff]  ;;  %v1094_v53 = vld [vmem:[%s828_s22 + $0x1a0] sm:$0xff]  ;;  %v1101_v54 = vld [vmem:[%s828_s22 + $0x1b8] sm:$0xff] }
  0x2f   : > { %v1104_v55 = vld [vmem:[%s828_s22 + $0x1b0] sm:$0xff]  ;;  %v1112_v56 = vld [vmem:[%s828_s22 + $0x1c8] sm:$0xff]  ;;  %v1115_v57 = vld [vmem:[%s828_s22 + $0x1c0] sm:$0xff] }
  0x30   : > { %268 = vrot.lane.b32.xlu1 %v881_v10, %s762_s23  ;;  %266 = vrot.lane.b32.xlu0 %v884_v11, %s762_s23  ;;  %1407 = vst [vmem:[#allocation5_spill] sm:$0xff] %v1112_v56  ;;  %1408 = vst [vmem:[#allocation6_spill] sm:$0xff] %v1115_v57  ;;  %v1124_v58 = vld [vmem:[%s828_s22 + $0x1d8] sm:$0xff]  ;;  %v1127_v59 = vld [vmem:[%s828_s22 + $0x1d0] sm:$0xff] }
  0x31   : > { %1409 = vst [vmem:[#allocation7_spill] sm:$0xff] %v1124_v58  ;;  %1410 = vst [vmem:[#allocation8_spill] sm:$0xff] %v1127_v59 }
  0x34   : > { %272 = vrot.lane.b32.xlu1 %v891_v12, %s762_s23  ;;  %270 = vrot.lane.b32.xlu0 %v894_v13, %s762_s23 }
  0x38   : > { %276 = vrot.lane.b32.xlu1 %v901_v14, %s762_s23  ;;  %274 = vrot.lane.b32.xlu0 %v904_v15, %s762_s23 }
  0x3c   : > { %280 = vrot.lane.b32.xlu1 %v911_v16, %s762_s23  ;;  %278 = vrot.lane.b32.xlu0 %v914_v17, %s762_s23 }
  0x40   : > { %284 = vrot.lane.b32.xlu1 %v921_v18, %s762_s23  ;;  %282 = vrot.lane.b32.xlu0 %v924_v19, %s762_s23 }
  0x44   : > { %288 = vrot.lane.b32.xlu1 %v931_v20, %s762_s23  ;;  %286 = vrot.lane.b32.xlu0 %v934_v21, %s762_s23 }
  0x48   : > { %292 = vrot.lane.b32.xlu1 %v941_v22, %s762_s23  ;;  %290 = vrot.lane.b32.xlu0 %v944_v23, %s762_s23 }
  0x4c   : > { %296 = vrot.lane.b32.xlu1 %v951_v24, %s762_s23  ;;  %294 = vrot.lane.b32.xlu0 %v954_v25, %s762_s23 }
  0x50   : > { %300 = vrot.lane.b32.xlu1 %v961_v26, %s762_s23  ;;  %298 = vrot.lane.b32.xlu0 %v964_v27, %s762_s23 }
  0x54   : > { %304 = vrot.lane.b32.xlu1 %v971_v28, %s762_s23  ;;  %302 = vrot.lane.b32.xlu0 %v974_v29, %s762_s23 }
  0x58   : > { %308 = vrot.lane.b32.xlu1 %v981_v30, %s762_s23  ;;  %306 = vrot.lane.b32.xlu0 %v984_v31, %s762_s23 }
  0x5c   : > { %312 = vrot.lane.b32.xlu1 %v991_v32, %s762_s23  ;;  %310 = vrot.lane.b32.xlu0 %v994_v33, %s762_s23 }
  0x60   : > { %316 = vrot.lane.b32.xlu1 %v1001_v34, %s762_s23  ;;  %314 = vrot.lane.b32.xlu0 %v1004_v35, %s762_s23 }
  0x64   : > { %320 = vrot.lane.b32.xlu1 %v1011_v36, %s762_s23  ;;  %318 = vrot.lane.b32.xlu0 %v1014_v37, %s762_s23 }
  0x68   : > { %324 = vrot.lane.b32.xlu1 %v1021_v38, %s762_s23  ;;  %322 = vrot.lane.b32.xlu0 %v1024_v39, %s762_s23 }
  0x6c   : > { %328 = vrot.lane.b32.xlu1 %v1031_v40, %s762_s23  ;;  %326 = vrot.lane.b32.xlu0 %v1034_v41, %s762_s23 }
  0x70   : > { %332 = vrot.lane.b32.xlu1 %v1041_v42, %s762_s23  ;;  %330 = vrot.lane.b32.xlu0 %v1044_v43, %s762_s23 }
  0x74   : > { %336 = vrot.lane.b32.xlu1 %v1051_v44, %s762_s23  ;;  %334 = vrot.lane.b32.xlu0 %v1054_v45, %s762_s23 }
  0x78   : > { %340 = vrot.lane.b32.xlu1 %v1061_v46, %s762_s23  ;;  %338 = vrot.lane.b32.xlu0 %v1064_v47, %s762_s23 }
  0x7c   : > { %344 = vrot.lane.b32.xlu1 %v1071_v48, %s762_s23  ;;  %342 = vrot.lane.b32.xlu0 %v1074_v49, %s762_s23 }
  0x80   : > { %348 = vrot.lane.b32.xlu1 %v1081_v50, %s762_s23  ;;  %346 = vrot.lane.b32.xlu0 %v1084_v51, %s762_s23 }
  0x84   : > { %352 = vrot.lane.b32.xlu1 %v1091_v52, %s762_s23  ;;  %350 = vrot.lane.b32.xlu0 %v1094_v53, %s762_s23 }
  0x88   : > { %356 = vrot.lane.b32.xlu1 %v1101_v54, %s762_s23  ;;  %354 = vrot.lane.b32.xlu0 %v1104_v55, %s762_s23 }
  0x8c   : > { %360 = vrot.lane.b32.xlu1 %v1112_v56, %s762_s23  ;;  %358 = vrot.lane.b32.xlu0 %v1115_v57, %s762_s23 }
  0x8e   : > { %v251_v60 = vpop.permute.xlu1 %250  ;;  %v247_v61 = vpop.permute.xlu0 %246 }
  0x8f   : > { %v441_v62 = vsel %vm438_vm0, %v831_v0, %v251_v60  ;;  %v439_v63 = vsel %vm438_vm0, %v834_v1, %v247_v61  ;;  %v1142_v0 = vld [vmem:[%s828_s22 + $0x1e8] sm:$0xff]  ;;  %v1145_v1 = vld [vmem:[%s828_s22 + $0x1e0] sm:$0xff] }
  0x90   : > { %505 = vst [vmem:[%s1133_s26 + $0x10] sm:$0xff] %v441_v62  ;;  %503 = vst [vmem:[%s1133_s26] sm:$0xff] %v439_v63  ;;  %364 = vrot.lane.b32.xlu1 %v1124_v58, %s762_s23  ;;  %362 = vrot.lane.b32.xlu0 %v1127_v59, %s762_s23 }
  0x91   : > { %v1158_v63 = vld [vmem:[%s828_s22 + $0x1f8] sm:$0xff]  ;;  %v1161_v59 = vld [vmem:[%s828_s22 + $0x1f0] sm:$0xff] }
  0x92   : > { %v253_v60 = vpop.permute.xlu1 %252  ;;  %v249_v61 = vpop.permute.xlu0 %248 }
  0x93   : > { %v442_v57 = vsel %vm438_vm0, %v841_v2, %v253_v60  ;;  %v440_v62 = vsel %vm438_vm0, %v844_v3, %v249_v61 }
  0x94   : > { %506 = vst [vmem:[%s1133_s26 + $0x18] sm:$0xff] %v442_v57  ;;  %504 = vst [vmem:[%s1133_s26 + $0x8] sm:$0xff] %v440_v62  ;;  %368 = vrot.lane.b32.xlu1 %v1142_v0, %s762_s23  ;;  %366 = vrot.lane.b32.xlu0 %v1145_v1, %s762_s23 }
  0x96   : > { %v257_v58 = vpop.permute.xlu1 %256  ;;  %v255_v56 = vpop.permute.xlu0 %254 }
  0x97   : > { %v444_v2 = vsel %vm438_vm0, %v851_v4, %v257_v58  ;;  %v443_v3 = vsel %vm438_vm0, %v854_v5, %v255_v56 }
  0x98   : > { %508 = vst [vmem:[%s1133_s26 + $0x28] sm:$0xff] %v444_v2  ;;  %507 = vst [vmem:[%s1133_s26 + $0x20] sm:$0xff] %v443_v3  ;;  %372 = vrot.lane.b32.xlu1 %v1158_v63, %s762_s23  ;;  %370 = vrot.lane.b32.xlu0 %v1161_v59, %s762_s23 }
  0x9a   : > { %v261_v57 = vpop.permute.xlu1 %260  ;;  %v259_v60 = vpop.permute.xlu0 %258 }
  0x9b   : > { %v446_v4 = vsel %vm438_vm0, %v861_v6, %v261_v57  ;;  %v445_v58 = vsel %vm438_vm0, %v864_v7, %v259_v60 }
  0x9c   : > { %510 = vst [vmem:[%s1133_s26 + $0x38] sm:$0xff] %v446_v4  ;;  %509 = vst [vmem:[%s1133_s26 + $0x30] sm:$0xff] %v445_v58 }
  0x9e   : > { %v265_v5 = vpop.permute.xlu1 %264  ;;  %v263_v56 = vpop.permute.xlu0 %262 }
  0x9f   : > { %v448_v61 = vsel %vm438_vm0, %v871_v8, %v265_v5  ;;  %v447_v62 = vsel %vm438_vm0, %v874_v9, %v263_v56 }
  0xa0   : > { %512 = vst [vmem:[%s1133_s26 + $0x48] sm:$0xff] %v448_v61  ;;  %511 = vst [vmem:[%s1133_s26 + $0x40] sm:$0xff] %v447_v62 }
  0xa2   : > { %v269_v2 = vpop.permute.xlu1 %268  ;;  %v267_v6 = vpop.permute.xlu0 %266 }
  0xa3   : > { %v450_v7 = vsel %vm438_vm0, %v881_v10, %v269_v2  ;;  %v449_v3 = vsel %vm438_vm0, %v884_v11, %v267_v6 }
  0xa4   : > { %514 = vst [vmem:[%s1133_s26 + $0x58] sm:$0xff] %v450_v7  ;;  %513 = vst [vmem:[%s1133_s26 + $0x50] sm:$0xff] %v449_v3 }
  0xa6   : > { %v273_v57 = vpop.permute.xlu1 %272  ;;  %v271_v8 = vpop.permute.xlu0 %270 }
  0xa7   : > { %v452_v9 = vsel %vm438_vm0, %v891_v12, %v273_v57  ;;  %v451_v60 = vsel %vm438_vm0, %v894_v13, %v271_v8 }
  0xa8   : > { %516 = vst [vmem:[%s1133_s26 + $0x68] sm:$0xff] %v452_v9  ;;  %515 = vst [vmem:[%s1133_s26 + $0x60] sm:$0xff] %v451_v60 }
  0xaa   : > { %v277_v4 = vpop.permute.xlu1 %276  ;;  %v275_v10 = vpop.permute.xlu0 %274 }
  0xab   : > { %v454_v11 = vsel %vm438_vm0, %v901_v14, %v277_v4  ;;  %v453_v58 = vsel %vm438_vm0, %v904_v15, %v275_v10 }
  0xac   : > { %518 = vst [vmem:[%s1133_s26 + $0x78] sm:$0xff] %v454_v11  ;;  %517 = vst [vmem:[%s1133_s26 + $0x70] sm:$0xff] %v453_v58 }
  0xae   : > { %v281_v5 = vpop.permute.xlu1 %280  ;;  %v279_v12 = vpop.permute.xlu0 %278 }
  0xaf   : > { %v456_v13 = vsel %vm438_vm0, %v911_v16, %v281_v5  ;;  %v455_v56 = vsel %vm438_vm0, %v914_v17, %v279_v12 }
  0xb0   : > { %520 = vst [vmem:[%s1133_s26 + $0x88] sm:$0xff] %v456_v13  ;;  %519 = vst [vmem:[%s1133_s26 + $0x80] sm:$0xff] %v455_v56 }
  0xb2   : > { %v285_v61 = vpop.permute.xlu1 %284  ;;  %v283_v14 = vpop.permute.xlu0 %282 }
  0xb3   : > { %v458_v15 = vsel %vm438_vm0, %v921_v18, %v285_v61  ;;  %v457_v62 = vsel %vm438_vm0, %v924_v19, %v283_v14 }
  0xb4   : > { %522 = vst [vmem:[%s1133_s26 + $0x98] sm:$0xff] %v458_v15  ;;  %521 = vst [vmem:[%s1133_s26 + $0x90] sm:$0xff] %v457_v62 }
  0xb6   : > { %v289_v2 = vpop.permute.xlu1 %288  ;;  %v287_v16 = vpop.permute.xlu0 %286 }
  0xb7   : > { %v460_v17 = vsel %vm438_vm0, %v931_v20, %v289_v2  ;;  %v459_v6 = vsel %vm438_vm0, %v934_v21, %v287_v16 }
  0xb8   : > { %524 = vst [vmem:[%s1133_s26 + $0xa8] sm:$0xff] %v460_v17  ;;  %523 = vst [vmem:[%s1133_s26 + $0xa0] sm:$0xff] %v459_v6 }
  0xba   : > { %v293_v7 = vpop.permute.xlu1 %292  ;;  %v291_v18 = vpop.permute.xlu0 %290 }
  0xbb   : > { %v462_v19 = vsel %vm438_vm0, %v941_v22, %v293_v7  ;;  %v461_v3 = vsel %vm438_vm0, %v944_v23, %v291_v18 }
  0xbc   : > { %526 = vst [vmem:[%s1133_s26 + $0xb8] sm:$0xff] %v462_v19  ;;  %525 = vst [vmem:[%s1133_s26 + $0xb0] sm:$0xff] %v461_v3 }
  0xbe   : > { %v297_v57 = vpop.permute.xlu1 %296  ;;  %v295_v20 = vpop.permute.xlu0 %294 }
  0xbf   : > { %v464_v21 = vsel %vm438_vm0, %v951_v24, %v297_v57  ;;  %v463_v8 = vsel %vm438_vm0, %v954_v25, %v295_v20 }
  0xc0   : > { %528 = vst [vmem:[%s1133_s26 + $0xc8] sm:$0xff] %v464_v21  ;;  %527 = vst [vmem:[%s1133_s26 + $0xc0] sm:$0xff] %v463_v8 }
  0xc2   : > { %v301_v9 = vpop.permute.xlu1 %300  ;;  %v299_v22 = vpop.permute.xlu0 %298 }
  0xc3   : > { %v466_v23 = vsel %vm438_vm0, %v961_v26, %v301_v9  ;;  %v465_v60 = vsel %vm438_vm0, %v964_v27, %v299_v22 }
  0xc4   : > { %530 = vst [vmem:[%s1133_s26 + $0xd8] sm:$0xff] %v466_v23  ;;  %529 = vst [vmem:[%s1133_s26 + $0xd0] sm:$0xff] %v465_v60 }
  0xc6   : > { %v305_v4 = vpop.permute.xlu1 %304  ;;  %v303_v24 = vpop.permute.xlu0 %302 }
  0xc7   : > { %v468_v25 = vsel %vm438_vm0, %v971_v28, %v305_v4  ;;  %v467_v10 = vsel %vm438_vm0, %v974_v29, %v303_v24  ;;  %v1411_v24 = vld [vmem:[#allocation5_spill] sm:$0xff] }
  0xc8   : > { %532 = vst [vmem:[%s1133_s26 + $0xe8] sm:$0xff] %v468_v25  ;;  %531 = vst [vmem:[%s1133_s26 + $0xe0] sm:$0xff] %v467_v10  ;;  %v1412_v25 = vld [vmem:[#allocation6_spill] sm:$0xff] }
  0xca   : > { %v309_v11 = vpop.permute.xlu1 %308  ;;  %v307_v26 = vpop.permute.xlu0 %306 }
  0xcb   : > { %v470_v27 = vsel %vm438_vm0, %v981_v30, %v309_v11  ;;  %v469_v58 = vsel %vm438_vm0, %v984_v31, %v307_v26  ;;  %v1413_v26 = vld [vmem:[#allocation7_spill] sm:$0xff] }
  0xcc   : > { %534 = vst [vmem:[%s1133_s26 + $0xf8] sm:$0xff] %v470_v27  ;;  %533 = vst [vmem:[%s1133_s26 + $0xf0] sm:$0xff] %v469_v58  ;;  %v1414_v27 = vld [vmem:[#allocation8_spill] sm:$0xff] }
  0xce   : > { %v313_v5 = vpop.permute.xlu1 %312  ;;  %v311_v28 = vpop.permute.xlu0 %310 }
  0xcf   : > { %v472_v29 = vsel %vm438_vm0, %v991_v32, %v313_v5  ;;  %v471_v12 = vsel %vm438_vm0, %v994_v33, %v311_v28 }
  0xd0   : > { %536 = vst [vmem:[%s1133_s26 + $0x108] sm:$0xff] %v472_v29  ;;  %535 = vst [vmem:[%s1133_s26 + $0x100] sm:$0xff] %v471_v12 }
  0xd2   : > { %v317_v13 = vpop.permute.xlu1 %316  ;;  %v315_v30 = vpop.permute.xlu0 %314 }
  0xd3   : > { %v474_v31 = vsel %vm438_vm0, %v1001_v34, %v317_v13  ;;  %v473_v56 = vsel %vm438_vm0, %v1004_v35, %v315_v30 }
  0xd4   : > { %538 = vst [vmem:[%s1133_s26 + $0x118] sm:$0xff] %v474_v31  ;;  %537 = vst [vmem:[%s1133_s26 + $0x110] sm:$0xff] %v473_v56 }
  0xd6   : > { %v321_v61 = vpop.permute.xlu1 %320  ;;  %v319_v32 = vpop.permute.xlu0 %318 }
  0xd7   : > { %v476_v33 = vsel %vm438_vm0, %v1011_v36, %v321_v61  ;;  %v475_v14 = vsel %vm438_vm0, %v1014_v37, %v319_v32 }
  0xd8   : > { %540 = vst [vmem:[%s1133_s26 + $0x128] sm:$0xff] %v476_v33  ;;  %539 = vst [vmem:[%s1133_s26 + $0x120] sm:$0xff] %v475_v14 }
  0xda   : > { %v325_v15 = vpop.permute.xlu1 %324  ;;  %v323_v34 = vpop.permute.xlu0 %322 }
  0xdb   : > { %v478_v35 = vsel %vm438_vm0, %v1021_v38, %v325_v15  ;;  %v477_v62 = vsel %vm438_vm0, %v1024_v39, %v323_v34 }
  0xdc   : > { %542 = vst [vmem:[%s1133_s26 + $0x138] sm:$0xff] %v478_v35  ;;  %541 = vst [vmem:[%s1133_s26 + $0x130] sm:$0xff] %v477_v62 }
  0xde   : > { %v329_v2 = vpop.permute.xlu1 %328  ;;  %v327_v36 = vpop.permute.xlu0 %326 }
  0xdf   : > { %v480_v37 = vsel %vm438_vm0, %v1031_v40, %v329_v2  ;;  %v479_v16 = vsel %vm438_vm0, %v1034_v41, %v327_v36 }
  0xe0   : > { %544 = vst [vmem:[%s1133_s26 + $0x148] sm:$0xff] %v480_v37  ;;  %543 = vst [vmem:[%s1133_s26 + $0x140] sm:$0xff] %v479_v16 }
  0xe2   : > { %v333_v17 = vpop.permute.xlu1 %332  ;;  %v331_v38 = vpop.permute.xlu0 %330 }
  0xe3   : > { %v482_v39 = vsel %vm438_vm0, %v1041_v42, %v333_v17  ;;  %v481_v6 = vsel %vm438_vm0, %v1044_v43, %v331_v38 }
  0xe4   : > { %546 = vst [vmem:[%s1133_s26 + $0x158] sm:$0xff] %v482_v39  ;;  %545 = vst [vmem:[%s1133_s26 + $0x150] sm:$0xff] %v481_v6 }
  0xe6   : > { %v337_v7 = vpop.permute.xlu1 %336  ;;  %v335_v40 = vpop.permute.xlu0 %334 }
  0xe7   : > { %v484_v41 = vsel %vm438_vm0, %v1051_v44, %v337_v7  ;;  %v483_v18 = vsel %vm438_vm0, %v1054_v45, %v335_v40 }
  0xe8   : > { %548 = vst [vmem:[%s1133_s26 + $0x168] sm:$0xff] %v484_v41  ;;  %547 = vst [vmem:[%s1133_s26 + $0x160] sm:$0xff] %v483_v18 }
  0xea   : > { %v341_v19 = vpop.permute.xlu1 %340  ;;  %v339_v42 = vpop.permute.xlu0 %338 }
  0xeb   : > { %v486_v43 = vsel %vm438_vm0, %v1061_v46, %v341_v19  ;;  %v485_v3 = vsel %vm438_vm0, %v1064_v47, %v339_v42 }
  0xec   : > { %550 = vst [vmem:[%s1133_s26 + $0x178] sm:$0xff] %v486_v43  ;;  %549 = vst [vmem:[%s1133_s26 + $0x170] sm:$0xff] %v485_v3 }
  0xee   : > { %v345_v57 = vpop.permute.xlu1 %344  ;;  %v343_v44 = vpop.permute.xlu0 %342 }
  0xef   : > { %v488_v45 = vsel %vm438_vm0, %v1071_v48, %v345_v57  ;;  %v487_v20 = vsel %vm438_vm0, %v1074_v49, %v343_v44 }
  0xf0   : > { %552 = vst [vmem:[%s1133_s26 + $0x188] sm:$0xff] %v488_v45  ;;  %551 = vst [vmem:[%s1133_s26 + $0x180] sm:$0xff] %v487_v20 }
  0xf2   : > { %v349_v21 = vpop.permute.xlu1 %348  ;;  %v347_v46 = vpop.permute.xlu0 %346 }
  0xf3   : > { %v490_v47 = vsel %vm438_vm0, %v1081_v50, %v349_v21  ;;  %v489_v8 = vsel %vm438_vm0, %v1084_v51, %v347_v46 }
  0xf4   : > { %554 = vst [vmem:[%s1133_s26 + $0x198] sm:$0xff] %v490_v47  ;;  %553 = vst [vmem:[%s1133_s26 + $0x190] sm:$0xff] %v489_v8 }
  0xf6   : > { %v353_v9 = vpop.permute.xlu1 %352  ;;  %v351_v48 = vpop.permute.xlu0 %350 }
  0xf7   : > { %v492_v49 = vsel %vm438_vm0, %v1091_v52, %v353_v9  ;;  %v491_v22 = vsel %vm438_vm0, %v1094_v53, %v351_v48 }
  0xf8   : > { %556 = vst [vmem:[%s1133_s26 + $0x1a8] sm:$0xff] %v492_v49  ;;  %555 = vst [vmem:[%s1133_s26 + $0x1a0] sm:$0xff] %v491_v22 }
  0xfa   : > { %v357_v23 = vpop.permute.xlu1 %356  ;;  %v355_v50 = vpop.permute.xlu0 %354 }
  0xfb   : > { %v494_v51 = vsel %vm438_vm0, %v1101_v54, %v357_v23  ;;  %v493_v60 = vsel %vm438_vm0, %v1104_v55, %v355_v50 }
  0xfc   : > { %558 = vst [vmem:[%s1133_s26 + $0x1b8] sm:$0xff] %v494_v51  ;;  %557 = vst [vmem:[%s1133_s26 + $0x1b0] sm:$0xff] %v493_v60 }
  0xfe   : > { %v361_v52 = vpop.permute.xlu1 %360  ;;  %v359_v4 = vpop.permute.xlu0 %358 }
  0xff   : > { %v496_v53 = vsel %vm438_vm0, %v1411_v24, %v361_v52  ;;  %v495_v10 = vsel %vm438_vm0, %v1412_v25, %v359_v4 }
 0x100   : > { %560 = vst [vmem:[%s1133_s26 + $0x1c8] sm:$0xff] %v496_v53  ;;  %559 = vst [vmem:[%s1133_s26 + $0x1c0] sm:$0xff] %v495_v10 }
 0x102   : > { %v365_v54 = vpop.permute.xlu1 %364  ;;  %v363_v11 = vpop.permute.xlu0 %362 }
 0x103   : > { %v498_v55 = vsel %vm438_vm0, %v1413_v26, %v365_v54  ;;  %v497_v58 = vsel %vm438_vm0, %v1414_v27, %v363_v11 }
 0x104   : > { %562 = vst [vmem:[%s1133_s26 + $0x1d8] sm:$0xff] %v498_v55  ;;  %561 = vst [vmem:[%s1133_s26 + $0x1d0] sm:$0xff] %v497_v58 }
 0x106   : > { %v369_v5 = vpop.permute.xlu1 %368  ;;  %v367_v28 = vpop.permute.xlu0 %366 }
 0x107   : > { %v500_v29 = vsel %vm438_vm0, %v1142_v0, %v369_v5  ;;  %v499_v12 = vsel %vm438_vm0, %v1145_v1, %v367_v28 }
 0x108   : > { %564 = vst [vmem:[%s1133_s26 + $0x1e8] sm:$0xff] %v500_v29  ;;  %563 = vst [vmem:[%s1133_s26 + $0x1e0] sm:$0xff] %v499_v12 }
 0x10a   : > { %v373_v13 = vpop.permute.xlu1 %372  ;;  %v371_v30 = vpop.permute.xlu0 %370 }
 0x10b   : > { %v502_v0 = vsel %vm438_vm0, %v1158_v63, %v373_v13  ;;  %v501_v1 = vsel %vm438_vm0, %v1161_v59, %v371_v30 }
 0x10c   : > { %566 = vst [vmem:[%s1133_s26 + $0x1f8] sm:$0xff] %v502_v0  ;;  %565 = vst [vmem:[%s1133_s26 + $0x1f0] sm:$0xff] %v501_v1 }
 0x10d   : > { %711 = shalt.err (!%p708_p3)
}
 0x10e   : > { %s712_s13 = scalar_lea.hbm %s1346_s2, 8192  ;;  %s716_s19 = scalar_lea.hbm %s1400_s1, 32768 }
 0x10f   : > { %p713_p4 = scmp.ne.s32.totalorder %s1346_s2, %s712_s13  ;;  %p717_p9 = scmp.lt.u32.totalorder %s1346_s2, %s1400_s1 }
 0x110   : > { %p718_p10 = scmp.lt.u32.totalorder %s716_s19, %s712_s13  ;;  %p720_p12 = scmp.lt.u32.totalorder %s712_s13, %s1346_s2 }
 0x111   : > { %p714_p7 = pnand %p713_p4, %p814_p5 }
 0x112   : > { %p719_p11 = por %p718_p10, %p717_p9 }
 0x113   : > { %p715_p8 = pneg %p714_p7 }
 0x114   : > { %p721_p13 = por %p720_p12, %p719_p11 }
 0x116   : > { %p722_p0 = pnand %p721_p13, %p715_p8 }
 0x118   : > { %725 = shalt.err (!%p722_p0)
}
 0x119   : > { %s764_s22 = smov 128   ;;  %s765_s23 = smov 8  }
 0x11a   : > { %656 = dma.vmem_to_hbm [thread:$0]  (%p814_p5), %s1348_s28, 8192, %s1346_s2, %s1358_s3, %s764_s22, %s764_s22, %s765_s23  }
 0x11b PF: > { %p662_p1 = scmp.ge.s32.totalorder %s760_s9, 2  ;;  %s596_s24 = sand.u32 1, %s748_s6  }
 0x11c   : > { %s597_s25 = scalar_lea.sflag [#allocation3], %s596_s24 }
 0x11d   : > { %p659_p2 = pnand %p662_p1, %p818_p6 }
 0x11f   : > { %743 = dma.done.wait (!%p659_p2), %s597_s25, 8192  }
 0x120   : > { %745 = vsyncadd (!%p659_p2), %s597_s25, 4294959104  ;;  %p11_p3 = scmp.ge.s32.totalorder %s801_s12, 6   ;;  %s1415_s6 = smov %s752_s7 }
 0x121   : > { %s1416_s7 = smov %s756_s8  ;;  %s1417_s8 = smov %s812_s15 }
 0x122   : > { %s1418_s9 = smov %s801_s12  ;;  %13 = sbr.rel (!%p11_p3) target bundleno = 3 (0x3), region = 59 }
 0x129   :  { %602 = vsyncpa [#allocation3], 1 }
 0x12a   :  { %604 = vsyncpa [#allocation3 + $0x1], 1 }

</bundles_post_ra>
